<compile_context>
chip_gen: v6e
topology: v6e:2x2x1
jax: 0.10.0
libtpu: 0.0.40
codegen_flags: <defaults>
</compile_context>

<pallas_src>
import functools
import math

import jax
import jax.numpy as jnp
from jax import lax
from jax.experimental import pallas as pl
from jax.experimental.pallas import tpu as pltpu


_LANE = 128


# ----------------------------- in-kernel helpers -----------------------------

def _top1_minus_top2(z, col, max1=None):
    """sorted_desc[:, 0] - sorted_desc[:, 1] along the class (lane) axis.

    z: (TB, K). `col` is a shared broadcasted_iota over the class axis (built
    once by the caller). `max1` may be supplied if the row max already exists.
    Ties: only the FIRST argmax occurrence is masked, so duplicated maxima
    still give a difference of 0, matching sort-descending semantics.
    """
    K = z.shape[1]
    if max1 is None:
        max1 = jnp.max(z, axis=1, keepdims=True)
    is_max = z == max1
    first_idx = jnp.min(jnp.where(is_max, col, K), axis=1, keepdims=True)
    masked = jnp.where(col == first_idx, -jnp.inf, z)
    max2 = jnp.max(masked, axis=1, keepdims=True)
    return max1 - max2


def _logits_and_selector_scores(x, w_kd, b_fc, inv_w_norms):
    """Base-model logits + the 5 raw selector scores for one batch tile.

    x: (TB, D), w_kd: (K, D) (lane-dense on D, contracted with dot_general so no
    transposed weight is ever materialized), b_fc / inv_w_norms: (1, K).
    Returns logits (TB, K) and S (TB, 5).
    """
    logits = lax.dot_general(
        x, w_kd,
        dimension_numbers=(((1,), (1,)), ((), ())),
        preferred_element_type=jnp.float32) + b_fc

    # softmax over the class dim (reciprocal-multiply instead of divide)
    m = jnp.max(logits, axis=1, keepdims=True)
    e = jnp.exp(logits - m)
    inv_den = pl.reciprocal(jnp.sum(e, axis=1, keepdims=True), approx=False)
    probs = e * inv_den

    sr_max = jnp.max(probs, axis=1, keepdims=True)                               # SRMax
    sr_doctor = 1.0 - pl.reciprocal(
        jnp.sum(probs * probs, axis=1, keepdims=True), approx=False)             # SRDoctor
    sr_entropy = jnp.sum(probs * jnp.log(probs + 1e-10), axis=1, keepdims=True)  # SREntropy (= -entropy)

    # RLGeoM: weight-row norms are constant -> precomputed reciprocal passed in.
    norm_logits = logits * inv_w_norms
    col = lax.broadcasted_iota(jnp.int32, logits.shape, 1)  # shared by both selectors
    rl_geo = _top1_minus_top2(norm_logits, col)                                  # RLGeoM
    rl_conf = _top1_minus_top2(logits, col, max1=m)                              # RLConfM

    S = jnp.concatenate([sr_max, sr_doctor, sr_entropy, rl_geo, rl_conf], axis=1)
    return logits, S


def _normalize_and_score(S, w1t, b1, w2t, b2, valid=None):
    """Per-selector min/max normalization over the FULL batch + 2-layer MLP.

    `valid` (same shape as S, bool) masks padded rows out of the global
    min/max; padded rows still get a (discarded) finite score.
    """
    if valid is None:
        mn = jnp.min(S, axis=0, keepdims=True)
        mx = jnp.max(S, axis=0, keepdims=True)
    else:
        mn = jnp.min(jnp.where(valid, S, jnp.inf), axis=0, keepdims=True)
        mx = jnp.max(jnp.where(valid, S, -jnp.inf), axis=0, keepdims=True)
    denom = mx - mn
    denom = jnp.where(denom == 0.0, 1.0, denom)
    Sn = 2.0 * (S - mn) * pl.reciprocal(denom, approx=False) - 1.0
    h = jnp.maximum(jnp.dot(Sn, w1t, preferred_element_type=jnp.float32) + b1, 0.0)
    return jnp.dot(h, w2t, preferred_element_type=jnp.float32) + b2


# --------------------------------- kernels -----------------------------------

def _fused_kernel(x_ref, w_ref, bfc_ref, invn_ref, w1_ref, b1_ref, w2_ref, b2_ref,
                  logits_ref, scores_ref):
    """Whole batch resident in VMEM: one kernel does everything."""
    logits, S = _logits_and_selector_scores(
        x_ref[...], w_ref[...], bfc_ref[...], invn_ref[...])
    logits_ref[...] = logits
    scores_ref[...] = _normalize_and_score(
        S, w1_ref[...], b1_ref[...], w2_ref[...], b2_ref[...])


def _tiled_fused_kernel(x_ref, w_ref, bfc_ref, invn_ref, w1_ref, b1_ref, w2_ref,
                        b2_ref, logits_ref, scores_ref, s_scratch,
                        *, tile_b, b_valid, b_pad):
    """Batch-tiled pass; global normalization + score MLP fused into the last
    grid step via a persistent (b_pad, 5) VMEM scratch."""
    i = pl.program_id(0)
    logits, S = _logits_and_selector_scores(
        x_ref[...], w_ref[...], bfc_ref[...], invn_ref[...])
    logits_ref[...] = logits

    row0 = pl.multiple_of(i * tile_b, tile_b)
    s_scratch[pl.ds(row0, tile_b), :] = S

    @pl.when(i == pl.num_programs(0) - 1)
    def _():
        S_all = s_scratch[...]
        if b_valid < b_pad:  # static: only emit the mask when padding exists
            row = lax.broadcasted_iota(jnp.int32, S_all.shape, 0)
            valid = row < b_valid
        else:
            valid = None
        scores_ref[...] = _normalize_and_score(
            S_all, w1_ref[...], b1_ref[...], w2_ref[...], b2_ref[...], valid)


# --------------------------- VMEM budgeting helpers ---------------------------

def _pad(v, m):
    return -(-v // m) * m


@functools.lru_cache(maxsize=None)
def _vmem_budget_bytes():
    """Per-core VMEM budget: query the chip, fall back to a v7x-safe 64 MiB."""
    phys = 64 * 1024 * 1024
    try:
        phys = int(pltpu.get_tpu_info().vmem_capacity_bytes)
    except Exception:
        pass
    # headroom for compiler-internal scratch; cap requests to a sane maximum.
    return max(min(phys - 16 * 1024 * 1024, 112 * 1024 * 1024), 32 * 1024 * 1024)


def _fused_vmem_estimate(B, D, K):
    x_b = _pad(B, 8) * _pad(D, _LANE) * 4
    w_b = _pad(K, 8) * _pad(D, _LANE) * 4
    work = 12 * _pad(B, 8) * _LANE * 4          # logits/probs/intermediates (K -> 128 lanes)
    return x_b + 2 * w_b + work + (1 << 20)


def _tiled_vmem_estimate(tile_b, b_pad, D, K):
    x_b = 2 * tile_b * _pad(D, _LANE) * 4        # double-buffered input tile
    w_b = 2 * _pad(K, 8) * _pad(D, _LANE) * 4    # fc weight (constant block index)
    lo_b = 2 * tile_b * _LANE * 4                # logits output tile
    sc_b = 2 * _pad(b_pad, 8) * _LANE * 4        # resident scores output block
    s_b = _pad(b_pad, 8) * _LANE * 4             # persistent S scratch
    work = 12 * tile_b * _LANE * 4
    return x_b + w_b + lo_b + sc_b + s_b + work + (1 << 20)


def _pick_tile_b(B, D, K, budget):
    """Largest tile (preferring multiples of 256, 512..2048 rows) that fits."""
    for t in (2048, 1792, 1536, 1280, 1024, 768, 512, 384, 256, 128, 64, 32, 16, 8):
        b_pad = _pad(max(B, t), t)
        if _tiled_vmem_estimate(t, b_pad, D, K) <= budget:
            return t
    return 8


# --------------------------------- wrappers ----------------------------------

_VMEM = pl.BlockSpec(memory_space=pltpu.MemorySpace.VMEM)


def prepare_params(raw):
    """One-time parameter preparation (hoisted out of the per-call path):
       - keep w_fc in its native (K, D) layout (no per-call transpose),
       - precompute 1 / (||w_fc[k]||_2 + 1e-8)  (constant w.r.t. the input),
       - pre-transpose the score-network weights and reshape the biases."""
    w_fc = raw["w_fc"]
    K = w_fc.shape[0]
    H = raw["w1"].shape[0]
    inv_w_norms = 1.0 / (jnp.sqrt(jnp.sum(w_fc * w_fc, axis=1)) + 1e-8)
    return dict(
        w_fc=w_fc,                           # (K, D)
        b_fc=raw["b_fc"].reshape(1, K),
        inv_w_norms=inv_w_norms.reshape(1, K),
        w1t=raw["w1"].T,                     # (5, H)
        b1=raw["b1"].reshape(1, H),
        w2t=raw["w2"].T,                     # (H, 1)
        b2=raw["b2"].reshape(1, 1),
    )


@jax.jit
def _fused_forward(x, params):
    B = x.shape[0]
    D = math.prod(x.shape[1:])
    K = params["w_fc"].shape[0]
    x2 = x.reshape(B, D)
    logits, scores = pl.pallas_call(
        _fused_kernel,
        out_shape=(jax.ShapeDtypeStruct((B, K), jnp.float32),
                   jax.ShapeDtypeStruct((B, 1), jnp.float32)),
        in_specs=[_VMEM] * 8,
        out_specs=(_VMEM, _VMEM),
        compiler_params=pltpu.CompilerParams(
            vmem_limit_bytes=_vmem_budget_bytes()),
    )(x2, params["w_fc"], params["b_fc"], params["inv_w_norms"],
      params["w1t"], params["b1"], params["w2t"], params["b2"])
    return logits, scores[:, 0]


@functools.partial(jax.jit, static_argnames=("tile_b",))
def _tiled_forward(x, params, tile_b):
    B = x.shape[0]
    D = math.prod(x.shape[1:])
    K = params["w_fc"].shape[0]
    H = params["w1t"].shape[1]
    x2 = x.reshape(B, D)

    b_pad = _pad(B, tile_b)
    if b_pad != B:
        x2 = jnp.pad(x2, ((0, b_pad - B), (0, 0)))
    grid = (b_pad // tile_b,)

    kernel = functools.partial(_tiled_fused_kernel,
                               tile_b=tile_b, b_valid=B, b_pad=b_pad)
    logits, scores = pl.pallas_call(
        kernel,
        out_shape=(jax.ShapeDtypeStruct((b_pad, K), jnp.float32),
                   jax.ShapeDtypeStruct((b_pad, 1), jnp.float32)),
        grid_spec=pltpu.PrefetchScalarGridSpec(
            num_scalar_prefetch=0,
            grid=grid,
            in_specs=[pl.BlockSpec((tile_b, D), lambda i: (i, 0)),
                      pl.BlockSpec((K, D), lambda i: (0, 0)),
                      pl.BlockSpec((1, K), lambda i: (0, 0)),
                      pl.BlockSpec((1, K), lambda i: (0, 0)),
                      pl.BlockSpec((5, H), lambda i: (0, 0)),
                      pl.BlockSpec((1, H), lambda i: (0, 0)),
                      pl.BlockSpec((H, 1), lambda i: (0, 0)),
                      pl.BlockSpec((1, 1), lambda i: (0, 0))],
            out_specs=[pl.BlockSpec((tile_b, K), lambda i: (i, 0)),
                       pl.BlockSpec((b_pad, 1), lambda i: (0, 0))],
            scratch_shapes=[pltpu.VMEM((b_pad, 5), jnp.float32)]),
        compiler_params=pltpu.CompilerParams(
            # batch axis must be sequential: the last step reads the full S scratch
            dimension_semantics=("arbitrary",),
            vmem_limit_bytes=_vmem_budget_bytes()),
    )(x2, params["w_fc"], params["b_fc"], params["inv_w_norms"],
      params["w1t"], params["b1"], params["w2t"], params["b2"])
    return logits[:B], scores[:B, 0]


def ensemble_sc_forward(x, params, *, force_tile_b=None):
    """x: (B, C, H, W) float32. Returns (logits (B, K), combined_scores (B,)).

    Routes everything that fits VMEM through one fused kernel; falls back to a
    single batch-tiled kernel (global normalization fused into the last step)
    for very large batches / feature dims. `force_tile_b` forces the tiled path
    (testing / benchmarking only)."""
    B = x.shape[0]
    D = math.prod(x.shape[1:])
    K = params["w_fc"].shape[0]

    if force_tile_b is not None:
        tile_b = int(force_tile_b)
        assert tile_b % 8 == 0, "tile_b must be a multiple of 8"
        return _tiled_forward(x, params, tile_b)

    budget = _vmem_budget_bytes()
    if _fused_vmem_estimate(B, D, K) <= (budget * 4) // 5:
        return _fused_forward(x, params)
    return _tiled_forward(x, params, _pick_tile_b(B, D, K, budget))


# -------------------------------- reference ----------------------------------

def _reference_forward(x, raw):
    """Pure-JAX reference mirroring the PyTorch semantics (for verification)."""
    B = x.shape[0]
    x2 = x.reshape(B, -1)
    logits = x2 @ raw["w_fc"].T + raw["b_fc"]

    probs = jax.nn.softmax(logits, axis=1)
    sr_max = jnp.max(probs, axis=1)
    sr_doctor = 1.0 - 1.0 / jnp.sum(probs ** 2, axis=1)
    sr_entropy = jnp.sum(probs * jnp.log(probs + 1e-10), axis=1)

    w_norms = jnp.linalg.norm(raw["w_fc"], axis=1)
    nl = logits / (w_norms + 1e-8)[None, :]
    s_nl = jnp.sort(nl, axis=1)[:, ::-1]
    rl_geo = s_nl[:, 0] - s_nl[:, 1]
    s_l = jnp.sort(logits, axis=1)[:, ::-1]
    rl_conf = s_l[:, 0] - s_l[:, 1]

    S = jnp.stack([sr_max, sr_doctor, sr_entropy, rl_geo, rl_conf])  # (5, B)
    mn = S.min(axis=1, keepdims=True)
    mx = S.max(axis=1, keepdims=True)
    denom = mx - mn
    denom = jnp.where(denom == 0.0, 1.0, denom)
    Sn = (2.0 * (S - mn) / denom - 1.0).T                             # (B, 5)

    h = jnp.maximum(Sn @ raw["w1"].T + raw["b1"], 0.0)
    out = (h @ raw["w2"].T + raw["b2"])[:, 0]
    return logits, out


if __name__ == "__main__":
    C, Hs, Ws = 4, 16, 16                # input: NCHW
    K = 10                               # classes of the synthetic base model
    H = 32                               # hidden_size of the score network
    D = C * Hs * Ws

    key = jax.random.PRNGKey(0)
    k0, k1, k2, k3, k4 = jax.random.split(key, 5)

    # synthetic base model: linear `.fc` head on the flattened input
    lim_fc = 1.0 / math.sqrt(D)
    w_fc = jax.random.uniform(k1, (K, D), jnp.float32, -lim_fc, lim_fc)
    b_fc = jnp.zeros((K,), jnp.float32)

    # score network: xavier_uniform weights, zero biases (matches __init__)
    lim1 = math.sqrt(6.0 / (5 + H))
    w1 = jax.random.uniform(k2, (H, 5), jnp.float32, -lim1, lim1)
    b1 = jnp.zeros((H,), jnp.float32)
    lim2 = math.sqrt(6.0 / (H + 1))
    w2 = jax.random.uniform(k3, (1, H), jnp.float32, -lim2, lim2)
    b2 = jnp.zeros((1,), jnp.float32)

    raw_params = dict(w_fc=w_fc, b_fc=b_fc, w1=w1, b1=b1, w2=w2, b2=b2)
    params = prepare_params(raw_params)

    # ---- small batch: auto-dispatch -> fused single-kernel path --------------
    B_small = 8
    x_small = jax.random.normal(k0, (B_small, C, Hs, Ws), jnp.float32)
    logits, scores = ensemble_sc_forward(x_small, params)
    jax.block_until_ready((logits, scores))
    ref_logits, ref_scores = _reference_forward(x_small, raw_params)
    assert logits.shape == (B_small, K) and scores.shape == (B_small,)
    assert jnp.allclose(logits, ref_logits, atol=1e-4, rtol=1e-4)
    assert jnp.allclose(scores, ref_scores, atol=1e-4, rtol=1e-4)

    # ---- larger, non-tile-divisible batch: forced single tiled kernel --------
    # (exercises batch padding + masked global min/max + fused last-step MLP)
    B_big = 200
    x_big = jax.random.normal(k4, (B_big, C, Hs, Ws), jnp.float32)
    logits2, scores2 = ensemble_sc_forward(x_big, params, force_tile_b=128)
    jax.block_until_ready((logits2, scores2))
    ref_logits2, ref_scores2 = _reference_forward(x_big, raw_params)
    assert logits2.shape == (B_big, K) and scores2.shape == (B_big,)
    assert jnp.allclose(logits2, ref_logits2, atol=1e-4, rtol=1e-4)
    assert jnp.allclose(scores2, ref_scores2, atol=1e-4, rtol=1e-4)

    # ---- auto dispatch on the larger batch must also match (fused route) -----
    logits3, scores3 = ensemble_sc_forward(x_big, params)
    jax.block_until_ready((logits3, scores3))
    assert jnp.allclose(logits3, ref_logits2, atol=1e-4, rtol=1e-4)
    assert jnp.allclose(scores3, ref_scores2, atol=1e-4, rtol=1e-4)

    print("KERNEL_OK")
</pallas_src>

<mosaic_0001>
module attributes {stable_mosaic.version = 11 : i64} {
  func.func @_fused_kernel(%arg0: memref<8x1024xf32, #tpu.memory_space<vmem>>, %arg1: memref<10x1024xf32, #tpu.memory_space<vmem>>, %arg2: memref<1x10xf32, #tpu.memory_space<vmem>>, %arg3: memref<1x10xf32, #tpu.memory_space<vmem>>, %arg4: memref<5x32xf32, #tpu.memory_space<vmem>>, %arg5: memref<1x32xf32, #tpu.memory_space<vmem>>, %arg6: memref<32x1xf32, #tpu.memory_space<vmem>>, %arg7: memref<1x1xf32, #tpu.memory_space<vmem>>, %arg8: memref<8x10xf32, #tpu.memory_space<vmem>>, %arg9: memref<8x1xf32, #tpu.memory_space<vmem>>) attributes {dimension_semantics = [], scalar_prefetch = 0 : i64, scratch_operands = 0 : i64, tpu.core_type = #tpu.core_type<tc>} {
    %c0 = arith.constant 0 : index
    %c0_0 = arith.constant 0 : index
    %0 = vector.load %arg0[%c0, %c0_0] : memref<8x1024xf32, #tpu.memory_space<vmem>>, vector<8x1024xf32>
    %c0_1 = arith.constant 0 : index
    %c0_2 = arith.constant 0 : index
    %1 = vector.load %arg1[%c0_1, %c0_2] : memref<10x1024xf32, #tpu.memory_space<vmem>>, vector<10x1024xf32>
    %c0_3 = arith.constant 0 : index
    %c0_4 = arith.constant 0 : index
    %2 = vector.load %arg2[%c0_3, %c0_4] : memref<1x10xf32, #tpu.memory_space<vmem>>, vector<1x10xf32>
    %c0_5 = arith.constant 0 : index
    %c0_6 = arith.constant 0 : index
    %3 = vector.load %arg3[%c0_5, %c0_6] : memref<1x10xf32, #tpu.memory_space<vmem>>, vector<1x10xf32>
    %cst = arith.constant dense<0.000000e+00> : vector<8x10xf32>
    %4 = tpu.matmul %0, %1, %cst {dimension_numbers = #tpu.dot_dimension_numbers<[1], [1], [0], [0], [0, 0, 1, 0], [], []>} : vector<8x1024xf32>, vector<10x1024xf32>, vector<8x10xf32> -> vector<8x10xf32>
    %5 = vector.broadcast %2 : vector<1x10xf32> to vector<8x10xf32>
    %6 = arith.addf %4, %5 : vector<8x10xf32>
    %cst_7 = arith.constant dense<0xFF800000> : vector<8xf32>
    %7 = vector.multi_reduction <maximumf>, %6, %cst_7 [1] : vector<8x10xf32> to vector<8xf32>
    %8 = vector.shape_cast %7 : vector<8xf32> to vector<8x1xf32>
    %9 = vector.broadcast %8 : vector<8x1xf32> to vector<8x10xf32>
    %10 = arith.subf %6, %9 : vector<8x10xf32>
    %11 = math.exp %10 : vector<8x10xf32>
    %cst_8 = arith.constant dense<0.000000e+00> : vector<8xf32>
    %12 = vector.multi_reduction <add>, %11, %cst_8 [1] : vector<8x10xf32> to vector<8xf32>
    %13 = vector.shape_cast %12 : vector<8xf32> to vector<8x1xf32>
    %14 = tpu.reciprocal %13 : vector<8x1xf32> -> vector<8x1xf32>
    %15 = vector.broadcast %14 : vector<8x1xf32> to vector<8x10xf32>
    %16 = arith.mulf %11, %15 : vector<8x10xf32>
    %cst_9 = arith.constant dense<0xFF800000> : vector<8xf32>
    %17 = vector.multi_reduction <maximumf>, %16, %cst_9 [1] : vector<8x10xf32> to vector<8xf32>
    %18 = vector.shape_cast %17 : vector<8xf32> to vector<8x1xf32>
    %19 = arith.mulf %16, %16 : vector<8x10xf32>
    %cst_10 = arith.constant dense<0.000000e+00> : vector<8xf32>
    %20 = vector.multi_reduction <add>, %19, %cst_10 [1] : vector<8x10xf32> to vector<8xf32>
    %21 = vector.shape_cast %20 : vector<8xf32> to vector<8x1xf32>
    %22 = tpu.reciprocal %21 : vector<8x1xf32> -> vector<8x1xf32>
    %cst_11 = arith.constant 1.000000e+00 : f32
    %23 = vector.broadcast %cst_11 : f32 to vector<8x1xf32>
    %24 = arith.subf %23, %22 : vector<8x1xf32>
    %cst_12 = arith.constant 1.000000e-10 : f32
    %25 = vector.broadcast %cst_12 : f32 to vector<8x10xf32>
    %26 = arith.addf %16, %25 : vector<8x10xf32>
    %27 = math.log %26 : vector<8x10xf32>
    %28 = arith.mulf %16, %27 : vector<8x10xf32>
    %cst_13 = arith.constant dense<0.000000e+00> : vector<8xf32>
    %29 = vector.multi_reduction <add>, %28, %cst_13 [1] : vector<8x10xf32> to vector<8xf32>
    %30 = vector.shape_cast %29 : vector<8xf32> to vector<8x1xf32>
    %31 = vector.broadcast %3 : vector<1x10xf32> to vector<8x10xf32>
    %32 = arith.mulf %6, %31 : vector<8x10xf32>
    %33 = tpu.iota {dimensions = array<i32: 1>} : vector<8x10xi32>
    %cst_14 = arith.constant dense<0xFF800000> : vector<8xf32>
    %34 = vector.multi_reduction <maximumf>, %32, %cst_14 [1] : vector<8x10xf32> to vector<8xf32>
    %35 = vector.shape_cast %34 : vector<8xf32> to vector<8x1xf32>
    %36 = vector.broadcast %35 : vector<8x1xf32> to vector<8x10xf32>
    %37 = arith.cmpf oeq, %32, %36 : vector<8x10xf32>
    %c10_i32 = arith.constant 10 : i32
    %38 = vector.broadcast %c10_i32 : i32 to vector<8x10xi32>
    %39 = arith.select %37, %33, %38 : vector<8x10xi1>, vector<8x10xi32>
    %cst_15 = arith.constant dense<2147483647> : vector<8xi32>
    %40 = vector.multi_reduction <minsi>, %39, %cst_15 [1] : vector<8x10xi32> to vector<8xi32>
    %41 = vector.shape_cast %40 : vector<8xi32> to vector<8x1xi32>
    %42 = vector.broadcast %41 : vector<8x1xi32> to vector<8x10xi32>
    %43 = arith.cmpi eq, %33, %42 : vector<8x10xi32>
    %cst_16 = arith.constant 0xFF800000 : f32
    %44 = vector.broadcast %cst_16 : f32 to vector<8x10xf32>
    %45 = arith.select %43, %44, %32 : vector<8x10xi1>, vector<8x10xf32>
    %cst_17 = arith.constant dense<0xFF800000> : vector<8xf32>
    %46 = vector.multi_reduction <maximumf>, %45, %cst_17 [1] : vector<8x10xf32> to vector<8xf32>
    %47 = vector.shape_cast %46 : vector<8xf32> to vector<8x1xf32>
    %48 = arith.subf %35, %47 : vector<8x1xf32>
    %49 = vector.broadcast %8 : vector<8x1xf32> to vector<8x10xf32>
    %50 = arith.cmpf oeq, %6, %49 : vector<8x10xf32>
    %c10_i32_18 = arith.constant 10 : i32
    %51 = vector.broadcast %c10_i32_18 : i32 to vector<8x10xi32>
    %52 = arith.select %50, %33, %51 : vector<8x10xi1>, vector<8x10xi32>
    %cst_19 = arith.constant dense<2147483647> : vector<8xi32>
    %53 = vector.multi_reduction <minsi>, %52, %cst_19 [1] : vector<8x10xi32> to vector<8xi32>
    %54 = vector.shape_cast %53 : vector<8xi32> to vector<8x1xi32>
    %55 = vector.broadcast %54 : vector<8x1xi32> to vector<8x10xi32>
    %56 = arith.cmpi eq, %33, %55 : vector<8x10xi32>
    %cst_20 = arith.constant 0xFF800000 : f32
    %57 = vector.broadcast %cst_20 : f32 to vector<8x10xf32>
    %58 = arith.select %56, %57, %6 : vector<8x10xi1>, vector<8x10xf32>
    %cst_21 = arith.constant dense<0xFF800000> : vector<8xf32>
    %59 = vector.multi_reduction <maximumf>, %58, %cst_21 [1] : vector<8x10xf32> to vector<8xf32>
    %60 = vector.shape_cast %59 : vector<8xf32> to vector<8x1xf32>
    %61 = arith.subf %8, %60 : vector<8x1xf32>
    %62 = tpu.concatenate %18, %24, %30, %48, %61 in 1 : vector<8x1xf32>, vector<8x1xf32>, vector<8x1xf32>, vector<8x1xf32>, vector<8x1xf32> -> vector<8x5xf32>
    %c0_22 = arith.constant 0 : index
    %c0_23 = arith.constant 0 : index
    %63 = vector.load %arg8[%c0_22, %c0_23] : memref<8x10xf32, #tpu.memory_space<vmem>>, vector<8x10xf32>
    tpu.vector_store %arg8[%c0_22, %c0_23], %6 {strides = array<i32>} : memref<8x10xf32, #tpu.memory_space<vmem>>, vector<8x10xf32>,
    %c0_24 = arith.constant 0 : index
    %c0_25 = arith.constant 0 : index
    %64 = vector.load %arg4[%c0_24, %c0_25] : memref<5x32xf32, #tpu.memory_space<vmem>>, vector<5x32xf32>
    %c0_26 = arith.constant 0 : index
    %c0_27 = arith.constant 0 : index
    %65 = vector.load %arg5[%c0_26, %c0_27] : memref<1x32xf32, #tpu.memory_space<vmem>>, vector<1x32xf32>
    %c0_28 = arith.constant 0 : index
    %c0_29 = arith.constant 0 : index
    %66 = vector.load %arg6[%c0_28, %c0_29] : memref<32x1xf32, #tpu.memory_space<vmem>>, vector<32x1xf32>
    %c0_30 = arith.constant 0 : index
    %c0_31 = arith.constant 0 : index
    %67 = vector.load %arg7[%c0_30, %c0_31] : memref<1x1xf32, #tpu.memory_space<vmem>>, vector<1x1xf32>
    %cst_32 = arith.constant dense<0x7F800000> : vector<5xf32>
    %68 = vector.multi_reduction <minimumf>, %62, %cst_32 [0] : vector<8x5xf32> to vector<5xf32>
    %69 = vector.shape_cast %68 : vector<5xf32> to vector<1x5xf32>
    %cst_33 = arith.constant dense<0xFF800000> : vector<5xf32>
    %70 = vector.multi_reduction <maximumf>, %62, %cst_33 [0] : vector<8x5xf32> to vector<5xf32>
    %71 = vector.shape_cast %70 : vector<5xf32> to vector<1x5xf32>
    %72 = arith.subf %71, %69 : vector<1x5xf32>
    %cst_34 = arith.constant 0.000000e+00 : f32
    %73 = vector.broadcast %cst_34 : f32 to vector<1x5xf32>
    %74 = arith.cmpf oeq, %72, %73 : vector<1x5xf32>
    %cst_35 = arith.constant 1.000000e+00 : f32
    %75 = vector.broadcast %cst_35 : f32 to vector<1x5xf32>
    %76 = arith.select %74, %75, %72 : vector<1x5xi1>, vector<1x5xf32>
    %77 = vector.broadcast %69 : vector<1x5xf32> to vector<8x5xf32>
    %78 = arith.subf %62, %77 : vector<8x5xf32>
    %cst_36 = arith.constant 2.000000e+00 : f32
    %79 = vector.broadcast %cst_36 : f32 to vector<8x5xf32>
    %80 = arith.mulf %79, %78 : vector<8x5xf32>
    %81 = tpu.reciprocal %76 : vector<1x5xf32> -> vector<1x5xf32>
    %82 = vector.broadcast %81 : vector<1x5xf32> to vector<8x5xf32>
    %83 = arith.mulf %80, %82 : vector<8x5xf32>
    %cst_37 = arith.constant 1.000000e+00 : f32
    %84 = vector.broadcast %cst_37 : f32 to vector<8x5xf32>
    %85 = arith.subf %83, %84 : vector<8x5xf32>
    %cst_38 = arith.constant dense<0.000000e+00> : vector<8x32xf32>
    %86 = tpu.matmul %85, %64, %cst_38 {dimension_numbers = #tpu.dot_dimension_numbers<[1], [0], [0], [1], [0, 0, 1, 1], [], []>} : vector<8x5xf32>, vector<5x32xf32>, vector<8x32xf32> -> vector<8x32xf32>
    %87 = vector.broadcast %65 : vector<1x32xf32> to vector<8x32xf32>
    %88 = arith.addf %86, %87 : vector<8x32xf32>
    %cst_39 = arith.constant 0.000000e+00 : f32
    %89 = vector.broadcast %cst_39 : f32 to vector<8x32xf32>
    %90 = arith.maximumf %88, %89 : vector<8x32xf32>
    %cst_40 = arith.constant dense<0.000000e+00> : vector<8x1xf32>
    %91 = tpu.matmul %90, %66, %cst_40 {dimension_numbers = #tpu.dot_dimension_numbers<[1], [0], [0], [1], [0, 0, 1, 1], [], []>} : vector<8x32xf32>, vector<32x1xf32>, vector<8x1xf32> -> vector<8x1xf32>
    %92 = vector.broadcast %67 : vector<1x1xf32> to vector<8x1xf32>
    %93 = arith.addf %91, %92 : vector<8x1xf32>
    %c0_41 = arith.constant 0 : index
    %c0_42 = arith.constant 0 : index
    %94 = vector.load %arg9[%c0_41, %c0_42] : memref<8x1xf32, #tpu.memory_space<vmem>>, vector<8x1xf32>
    tpu.vector_store %arg9[%c0_41, %c0_42], %93 {strides = array<i32>} : memref<8x1xf32, #tpu.memory_space<vmem>>, vector<8x1xf32>,
    return
  }
}

</mosaic_0001>

<bundles_post_ra>
// kernel: _fused_forward.1
= control target key start
LH: loop header
LB: loop body
LE: loop exit
PB: predicated region body
PF: predicated region fallthrough
CT: control target
= control target key end

     0   :  { %s922_s0 = inlined_call_operand.vmem [shape: f32[8,1024], index: 0, kind: input, shape index: {}]   ;;  %s923_s1 = inlined_call_operand.vmem [shape: f32[10,1024], index: 1, kind: input, shape index: {}]   ;;  %s924_s2 = inlined_call_operand.vmem [shape: f32[1,10], index: 2, kind: input, shape index: {}]   ;;  %s925_s3 = inlined_call_operand.vmem [shape: f32[1,10], index: 3, kind: input, shape index: {}]   ;;  %s926_s4 = inlined_call_operand.vmem [shape: f32[5,32], index: 4, kind: input, shape index: {}]   ;;  %s927_s5 = inlined_call_operand.vmem [shape: f32[1,32], index: 5, kind: input, shape index: {}]   ;;  %s928_s6 = inlined_call_operand.vmem [shape: f32[32,1], index: 6, kind: input, shape index: {}]   ;;  %s929_s7 = inlined_call_operand.<no memory space> [shape: f32[1,1], index: 7, kind: input, shape index: {}]   ;;  %s930_s8 = inlined_call_operand.hbm [shape: f32[8,10], index: 8, kind: output, shape index: {0}]   ;;  %s931_s9 = inlined_call_operand.vmem [shape: f32[8,1], index: 9, kind: output, shape index: {1}]  }
   0x1   :  { %v15_v0 = vstv %s929_s7 }
   0x2   :  { %16 = vst [vmem:[#allocation2] sm:$0x1] %v15_v0 }
   0x3   :  { %v51_v1 = vld [vmem:[%s923_s1 + $0x48] sm:$0x3]  ;;  %v53_v2 = vld [vmem:[%s923_s1 + $0x58] sm:$0x3]  ;;  %v50_v3 = vld [vmem:[%s923_s1 + $0x40] sm:$0x3] }
   0x4   :  { %94 = vmatprep.subr.mxu0 %v51_v1  ;;  %164 = vmatprep.subr.mxu1 %v53_v2  ;;  %v52_v4 = vld [vmem:[%s923_s1 + $0x50] sm:$0x3]  ;;  %v43_v5 = vld [vmem:[%s923_s1 + $0x8] sm:$0xff]  ;;  %v45_v6 = vld [vmem:[%s923_s1 + $0x18] sm:$0xff] }
   0x5   :  { %95 = vmatpush1.xpose.msra.mxu0 %v50_v3  ;;  %165 = vmatpush1.xpose.msra.mxu1 %v52_v4  ;;  %v35_v7 = vld [vmem:[%s922_s0 + $0x8] sm:$0xff]  ;;  %v42_v8 = vld [vmem:[%s923_s1] sm:$0xff]  ;;  %v44_v9 = vld [vmem:[%s923_s1 + $0x10] sm:$0xff] }
   0x6   :  { %96 = vmatprep.subr.mxu0 %v43_v5  ;;  %166 = vmatprep.subr.mxu1 %v45_v6  ;;  %v37_v10 = vld [vmem:[%s922_s0 + $0x18] sm:$0xff]  ;;  %v55_v11 = vld [vmem:[%s923_s1 + $0x68] sm:$0x3]  ;;  %v34_v13 = vld [vmem:[%s922_s0] sm:$0xff] }
   0x7   :  { %130 = vmatprep.mubr.f32.mxu0 %v35_v7  ;;  %200 = vmatprep.mubr.f32.mxu1 %v37_v10  ;;  %v57_v12 = vld [vmem:[%s923_s1 + $0x78] sm:$0x3]  ;;  %v36_v14 = vld [vmem:[%s922_s0 + $0x10] sm:$0xff]  ;;  %v54_v15 = vld [vmem:[%s923_s1 + $0x60] sm:$0x3] }
   0x8   :  { %v56_v16 = vld [vmem:[%s923_s1 + $0x70] sm:$0x3]  ;;  %v47_v17 = vld [vmem:[%s923_s1 + $0x28] sm:$0xff]  ;;  %v49_v18 = vld [vmem:[%s923_s1 + $0x38] sm:$0xff] }
   0x9   :  { %97 = vmatpush1.xpose.msra.mxu0 %v42_v8  ;;  %167 = vmatpush1.xpose.msra.mxu1 %v44_v9 }
   0xa   :  { %234 = vmatprep.subr.mxu0 %v55_v11  ;;  %304 = vmatprep.subr.mxu1 %v57_v12 }
   0xb   :  { %17 = vsyncpa [#allocation4], 0  ;;  %v39_v19 = vld [vmem:[%s922_s0 + $0x28] sm:$0xff]  ;;  %v41_v20 = vld [vmem:[%s922_s0 + $0x38] sm:$0xff]  ;;  %vm346_vm0 = vcmask 80896   ;;  %v381_v42 = vlaneseq  ;;  %vm480_vm7 = vcmask 1044480  }
   0xc   :  { %131 = vmatmul.mubr.f32.vlgmr.msra.gmra.mxu0 %v34_v13  ;;  %201 = vmatmul.mubr.f32.vlgmr.msra.gmra.mxu1 %v36_v14  ;;  %v46_v21 = vld [vmem:[%s923_s1 + $0x20] sm:$0xff]  ;;  %v48_v22 = vld [vmem:[%s923_s1 + $0x30] sm:$0xff]  ;;  %vm721_vm8 = vmmov 0   ;;  %vm432_vm9 = vcmask 7168   ;;  %vm434_vm10 = vcmask 15360   ;;  %vm436_vm11 = vcmask 23552  }
   0xd   :  { %235 = vmatpush1.xpose.msra.mxu0 %v54_v15  ;;  %305 = vmatpush1.xpose.msra.mxu1 %v56_v16  ;;  %v38_v23 = vld [vmem:[%s922_s0 + $0x20] sm:$0xff]  ;;  %v40_v24 = vld [vmem:[%s922_s0 + $0x30] sm:$0xff]  ;;  %v865_v43 = vand.u32 127, %v381_v42  ;;  %vm438_vm12 = vcmask 31744   ;;  %vm448_vm13 = vcmask 39936   ;;  %vm561_vm15 = vcmask 261120  }
   0xe   :  { %236 = vmatprep.subr.mxu0 %v47_v17  ;;  %306 = vmatprep.subr.mxu1 %v49_v18  ;;  %v654_v25 = vld [vmem:[%s924_s2] ss:$0 sm:$0xff]  ;;  %s722_s25 = smov [#allocation3]  }
   0xf   :  { %270 = vmatprep.mubr.f32.mxu0 %v39_v19  ;;  %340 = vmatprep.mubr.f32.mxu1 %v41_v20  ;;  %v655_v37 = vld [vmem:[%s925_s3] ss:$0 sm:$0xff]  ;;  %s642_s26 = sshll.u32 %s722_s25, 4  ;;  %s643_s26 = int_to_ptr.vmem [resolvable:$true] %s642_s26 }
  0x10   :  { %s698_s27 = scalar_lea.vmem %s643_s26, 128  ;;  %p703_p1 = scmp.lt.s32.totalorder %s643_s26, %s643_s26 }
  0x11   :  { %237 = vmatpush1.xpose.msra.mxu0 %v46_v21  ;;  %307 = vmatpush1.xpose.msra.mxu1 %v48_v22  ;;  %p699_p0 = scmp.ne.s32.totalorder %s643_s26, %s698_s27  ;;  %p704_p2 = scmp.lt.s32.totalorder %s698_s27, %s698_s27 }
  0x13   :  { %p705_p3 = por %p704_p2, %p703_p1 }
  0x14   :  { %271 = vmatmul.mubr.f32.vlgmr.msra.gmra.mxu0 %v38_v23  ;;  %341 = vmatmul.mubr.f32.vlgmr.msra.gmra.mxu1 %v40_v24 }
  0x15   :  { %p706_p4 = pnand %p705_p3, %p699_p0 }
  0xcc   :  { %v132_v26 = vpop.f32.mrf.mxu0  ;;  %v202_v27 = vpop.f32.mrf.mxu1 }
  0xcd   :  { %v133_v30 = vadd.f32 %v654_v25, %v132_v26 }
  0xce   :  { %v134_v28 = vpop.f32.mrf.mxu0  ;;  %v204_v29 = vpop.f32.mrf.mxu1 }
  0xcf   :  { %v203_v31 = vadd.f32 %v202_v27, %v133_v30  ;;  %v441_v27 = vld [vmem:[%s926_s4] sm:$0x1f]  ;;  %v720_v28 = vmov 0.0   ;;  %v446_v29 = vld [vmem:[%s928_s6 + $0x18] sm:$0xff] }
  0xd0   :  { %669 = vmatprep.subr.mxu0 %v720_v28  ;;  %671 = vmatprep.mubr.msk.f32.mxu0 %vm721_vm8, %v720_v28 }
  0xd1   :  { %670 = vmatpush3.msk.msra.mxu0 %vm480_vm7, %v441_v27  ;;  %674 = vmatprep.subr.mxu1 %v720_v28 }
  0xd2   :  { %682 = vmatprep.mubr.msk.f32.mxu1 %vm721_vm8, %v720_v28  ;;  %675 = vmatpush3.msra.mxu1 %v446_v29 }
  0xd3   :  { %676 = vmatprep.subr.mxu1 %v720_v28 }
  0xd4   :  { %v272_v32 = vpop.f32.mrf.mxu0  ;;  %v342_v33 = vpop.f32.mrf.mxu1 }
  0xd5   :  { %v273_v34 = vadd.f32 %v272_v32, %v203_v31 }
  0xd6   :  { %v274_v35 = vpop.f32.mrf.mxu0  ;;  %v344_v36 = vpop.f32.mrf.mxu1 }
  0xd7   :  { %v854_v38 = vadd.f32 %v342_v33, %v273_v34 }
  0xd9   :  { %v857_v39 = vmul.f32 %v655_v37, %v854_v38  ;;  %440 = vst.msk [vmem:[#allocation3] sm:$0xff] %vm346_vm0, %v854_v38  ;;  %v347_v41 = vsel %vm346_vm0, %v854_v38, -inf }
  0xdb   :  { %v383_v40 = vsel %vm346_vm0, %v857_v39, -inf }
  0xdc   :  { %384 = vmax.xlane.f32.xlu0 %v383_v40 }
  0xe0   :  { %348 = vmax.xlane.f32.xlu0 %v347_v41 }
 0x165   :  { %v867_v44 = vpop.xlane.xlu0 %384 }
 0x166   :  { %vm386_vm1 = vcmp.eq.f32.partialorder %v857_v39, %v867_v44 }
 0x167   :  { %v387_v45 = vsel %vm386_vm1, %v865_v43, 10 }
 0x168   :  { %v388_v46 = vsel %vm346_vm0, %v387_v45, 2147483647 }
 0x169   :  { %v873_v47 = vpop.xlane.xlu0 %348  ;;  %v390_v48 = vshra.s32 %v388_v46, 16  ;;  %v389_v58 = vand.u32 65535, %v388_v46 }
 0x16a   :  { %v350_v49 = vsub.f32 %v854_v38, %v873_v47  ;;  %vm409_vm2 = vcmp.eq.f32.partialorder %v854_v38, %v873_v47 }
 0x16b   :  { %v392_v50 = vcvt.s32.f32 %v390_v48  ;;  %v410_v51 = vsel %vm409_vm2, %v865_v43, 10  ;;  %v391_v60 = vcvt.s32.f32 %v389_v58 }
 0x16c   :  { %v351_v52 = vmul.f32 1.442695, %v350_v49  ;;  %v411_v53 = vsel %vm346_vm0, %v410_v51, 2147483647 }
 0x16d   :  { %393 = vmin.xlane.f32.xlu1 %v392_v50  ;;  %v413_v54 = vshra.s32 %v411_v53, 16  ;;  %v412_v61 = vand.u32 65535, %v411_v53 }
 0x16e   :  { %688 = vpow2.f32 %v351_v52 }
 0x16f   :  { %v415_v55 = vcvt.s32.f32 %v413_v54  ;;  %v414_v0 = vcvt.s32.f32 %v412_v61 }
 0x171   :  { %416 = vmin.xlane.f32.xlu1 %v415_v55 }
 0x17b   :  { %v689_v56 = vpop.eup %688 }
 0x17c   :  { %v353_v57 = vsel %vm346_vm0, %v689_v56, 0.0 }
 0x17d   :  { %354 = vadd.xlane.f32.xlu0 %v353_v57 }
 0x1f6   :  { %v394_v59 = vpop.xlane.xlu1 %393 }
 0x1f7   :  { %vm395_vm3 = vcmp.eq.f32.partialorder %v392_v50, %v394_v59  ;;  %v400_v13 = vcvt.f32.s32 %v394_v59 }
 0x1f8   :  { %v396_v62 = vsel %vm395_vm3, %v391_v60, inf }
 0x1f9   :  { %397 = vmin.xlane.f32.xlu1 %v396_v62  ;;  %v401_v15 = vshll.u32 %v400_v13, 16 }
 0x1fa   :  { %v417_v63 = vpop.xlane.xlu1 %416 }
 0x1fb   :  { %vm418_vm4 = vcmp.eq.f32.partialorder %v415_v55, %v417_v63  ;;  %v423_v16 = vcvt.f32.s32 %v417_v63 }
 0x1fc   :  { %v419_v1 = vsel %vm418_vm4, %v414_v0, inf  ;;  %v445_v0 = vld [vmem:[%s928_s6 + $0x10] sm:$0xff] }
 0x1fd   :  { %420 = vmin.xlane.f32.xlu0 %v419_v1  ;;  %v424_v20 = vshll.u32 %v423_v16, 16  ;;  %677 = vmatpush3.msra.mxu1 %v445_v0  ;;  %v444_v1 = vld [vmem:[%s928_s6 + $0x8] sm:$0xff] }
 0x1fe   :  { %678 = vmatprep.subr.mxu1 %v720_v28 }
 0x1ff   :  { %679 = vmatpush3.msra.mxu1 %v444_v1 }
 0x200   :  { %680 = vmatprep.subr.mxu1 %v720_v28 }
 0x206   :  { %v355_v2 = vpop.xlane.xlu0 %354 }
 0x207   :  { %690 = vrcp.f32 %v355_v2  ;;  %v443_v2 = vld [vmem:[%s928_s6] sm:$0xff] }
 0x208   :  { %681 = vmatpush3.msra.mxu1 %v443_v2 }
 0x214   :  { %v691_v3 = vpop.eup %690 }
 0x215   :  { %v357_v4 = vmul.f32 %v691_v3, %v689_v56  ;;  %v657_v3 = vld [vmem:[%s927_s5] ss:$0 sm:$0xff] }
 0x217   :  { %v358_v5 = vsel %vm346_vm0, %v357_v4, -inf  ;;  %v361_v6 = vmul.f32 %v357_v4, %v357_v4  ;;  %v367_v7 = vadd.f32 1e-10, %v357_v4 }
 0x218   :  { %359 = vmax.xlane.f32.xlu0 %v358_v5 }
 0x219   :  { %v362_v8 = vsel %vm346_vm0, %v361_v6, 0.0  ;;  %692 = vlog2.f32 %v367_v7 }
 0x21a   :  { %363 = vadd.xlane.f32.xlu1 %v362_v8 }
 0x226   :  { %v693_v9 = vpop.eup %692 }
 0x227   :  { %v369_v10 = vmul.f32 0.6931472, %v693_v9 }
 0x229   :  { %v370_v11 = vmul.f32 %v369_v10, %v357_v4 }
 0x22b   :  { %v371_v12 = vsel %vm346_vm0, %v370_v11, 0.0 }
 0x22c   :  { %372 = vadd.xlane.f32.xlu0 %v371_v12 }
 0x282   :  { %v398_v14 = vpop.xlane.xlu1 %397 }
 0x283   :  { %v399_v17 = vcvt.f32.s32 %v398_v14 }
 0x285   :  { %v402_v18 = vadd.s32 %v401_v15, %v399_v17 }
 0x286   :  { %v421_v19 = vpop.xlane.xlu0 %420 }
 0x287   :  { %v422_v21 = vcvt.f32.s32 %v421_v19  ;;  %vm403_vm5 = vcmp.eq.s32.totalorder %v865_v43, %v402_v18 }
 0x288   :  { %v404_v22 = vsel %vm403_vm5, -inf, %v857_v39 }
 0x289   :  { %v425_v23 = vadd.s32 %v424_v20, %v422_v21  ;;  %v405_v24 = vsel %vm346_vm0, %v404_v22, -inf }
 0x28a   :  { %406 = vmax.xlane.f32.xlu1 %v405_v24 }
 0x28b   :  { %vm426_vm6 = vcmp.eq.s32.totalorder %v865_v43, %v425_v23 }
 0x28c   :  { %v427_v25 = vsel %vm426_vm6, -inf, %v854_v38 }
 0x28d   :  { %v428_v26 = vsel %vm346_vm0, %v427_v25, -inf }
 0x28e   :  { %429 = vmax.xlane.f32.xlu1 %v428_v26 }
 0x2a1   :  { %v360_v32 = vpop.xlane.xlu0 %359 }
 0x2a3   :  { %v364_v30 = vpop.xlane.xlu1 %363 }
 0x2a4   :  { %694 = vrcp.f32 %v364_v30 }
 0x2b1   :  { %v695_v31 = vpop.eup %694 }
 0x2b2   :  { %v366_v33 = vsub.f32 1.0, %v695_v31 }
 0x2b4   :  { %v433_v35 = vsel %vm432_vm9, %v360_v32, %v366_v33 }
 0x2b5   :  { %v373_v36 = vpop.xlane.xlu0 %372 }
 0x2b6   :  { %v435_v39 = vsel %vm434_vm10, %v433_v35, %v373_v36 }
 0x313   :  { %v407_v34 = vpop.xlane.xlu1 %406 }
 0x314   :  { %v408_v37 = vsub.f32 %v867_v44, %v407_v34 }
 0x316   :  { %v437_v41 = vsel %vm436_vm11, %v435_v39, %v408_v37 }
 0x317   :  { %v430_v38 = vpop.xlane.xlu1 %429 }
 0x318   :  { %v431_v40 = vsub.f32 %v873_v47, %v430_v38 }
 0x31a   :  { %v439_v42 = vsel %vm438_vm12, %v437_v41, %v431_v40 }
 0x31b   :  { %v449_v43 = vsel %vm448_vm13, %v439_v42, inf  ;;  %v456_v45 = vsel %vm448_vm13, %v439_v42, -inf }
 0x31c   :  { %v450_v46 = vrot.slane %v449_v43, 4  ;;  %v457_v48 = vrot.slane %v456_v45, 4 }
 0x31e   :  { %v451_v49 = vmin.f32 %v449_v43, %v450_v46  ;;  %v458_v50 = vmax.f32 %v456_v45, %v457_v48 }
 0x320   :  { %v452_v51 = vrot.slane %v451_v49, 2  ;;  %v459_v52 = vrot.slane %v458_v50, 2 }
 0x322   :  { %v453_v44 = vmin.f32 %v451_v49, %v452_v51  ;;  %v460_v53 = vmax.f32 %v458_v50, %v459_v52 }
 0x324   :  { %v454_v54 = vrot.slane %v453_v44, 1  ;;  %v461_v55 = vrot.slane %v460_v53, 1 }
 0x326   :  { %v455_v56 = vmin.f32 %v453_v44, %v454_v54  ;;  %v462_v57 = vmax.f32 %v460_v53, %v461_v55 }
 0x328   :  { %v463_v47 = vsub.f32 %v462_v57, %v455_v56  ;;  %v466_v59 = vsub.f32 %v439_v42, %v455_v56 }
 0x32a   :  { %vm464_vm14 = vcmp.eq.f32.partialorder %v463_v47, 0.0  ;;  %v467_v60 = vmul.f32 2.0, %v466_v59 }
 0x32b   :  { %v465_v58 = vsel %vm464_vm14, 1.0, %v463_v47 }
 0x32c   :  { %696 = vrcp.f32 %v465_v58 }
 0x339   :  { %v697_v61 = vpop.eup %696 }
 0x33a   :  { %v469_v62 = vmul.f32 %v697_v61, %v467_v60 }
 0x33c   :  { %v656_v63 = vadd.f32 -1.0, %v469_v62 }
 0x33e   :  { %672 = vmatmul.mubr.msk.f32.vlgmr.msra.gmra.mxu0 %vm448_vm13, %v656_v63 }
 0x3fe   :  { %v550_v4 = vpop.f32.mrf.mxu0 }
 0x3ff   :  { %v551_v5 = vadd.f32 %v657_v3, %v550_v4 }
 0x400   :  { %v673_v6 = vpop.f32.mrf.mxu0 }
 0x401   :  { %v554_v7 = vmax.f32 %v551_v5, 0.0 }
 0x403   :  { %683 = vmatmul.mubr.msk.f32.vlgmr.msra.gmra.mxu1 %vm561_vm15, %v554_v7 }
 0x404   :  { %709 = shalt.err (!%p706_p4)
}
 0x405   :  { %645 = dma.vmem_to_hbm [thread:$0]  %s643_s26, 128, %s930_s8, [#allocation4]   ;;  %v660_v8 = vld [vmem:[#allocation2] ss:$0 sm:$0xff] }
 0x4c3   :  { %v631_v9 = vpop.f32.mrf.mxu1 }
 0x4c4   :  { %v632_v10 = vadd.f32 %v660_v8, %v631_v9 }
 0x4c5   :  { %v684_v11 = vpop.f32.mrf.mxu1 }
 0x4c6   :  { %635 = vst.msk [vmem:[%s931_s9] sm:$0xff] %vm432_vm9, %v632_v10 }
 0x4c7   :  { %718 = dma.done.wait [#allocation4], 128  }
 0x4c8   :  { %719 = vsyncadd [#allocation4], 4294967168 }
 0x4c9   :  { %653 = vsyncpa [#allocation4], 1 }

</bundles_post_ra>
